<compile_context>
chip_gen: v7x
topology: tpu7x:2x2x1
jax: 0.10.0
libtpu: 0.0.40
codegen_flags: <defaults>
</compile_context>

<pallas_src>
import functools

import jax
import jax.numpy as jnp
from jax import lax
from jax.experimental import pallas as pl
from jax.experimental.pallas import tpu as pltpu


def _round_up(n, m):
    return ((n + m - 1) // m) * m


def _choose_block_b(batch, lc_pad, kp, dp, seq_len):
    """Pick how many batch elements to fold into one grid step."""
    bb = max(1, 256 // lc_pad)          # enough M rows to fill the MXU (256 on v6e/v7x)
    bb = min(bb, batch)
    if batch >= 2:                      # keep >= 2 grid steps so both v7x TCs get work
        bb = min(bb, max(1, batch // 2))

    def step_bytes(b):                  # double-buffered ins + outs per grid step
        ins = 2 * 2 * b * lc_pad * kp * 2            # bf16 inputs
        outs = 2 * 2 * b * seq_len * dp * 4 + 2 * 2 * b * dp * 4
        return ins + outs

    while bb > 1 and step_bytes(bb) > (8 << 20):     # stay well inside v7x VMEM
        bb //= 2
    return bb


def _abcnn2_kernel(x1u_ref, x2u_ref, w_ref, b_ref,
                   w1_ref, w2_ref, a1_ref, a2_ref,
                   *, bb, fw, seq_len, lc, lc_pad):
    """One batch block (bb sentences-pairs) per grid step.

    x1u_ref, x2u_ref : (1, bb*lc_pad, Kp)  bf16  im2col'd, zero-padded inputs
    w_ref            : (Kp, Dp)            bf16  conv weight (taps folded into K)
    b_ref            : (1, Dp)             f32   conv bias (zero-padded)
    w1_ref, w2_ref   : (1, bb*L, Dp)       f32   attention w-ap outputs
    a1_ref, a2_ref   : (1, bb, Dp)         f32   all-ap outputs
    """
    L, Lc = seq_len, lc
    Dp = w_ref.shape[-1]

    w = w_ref[...]                                   # (Kp, Dp) bf16
    bias = b_ref[...]                                # (1, Dp)  f32

    # --- wide conv + tanh: whole batch block folded into the M dimension ---
    c1_all = jnp.tanh(jnp.dot(x1u_ref[0], w, preferred_element_type=jnp.float32) + bias)
    c2_all = jnp.tanh(jnp.dot(x2u_ref[0], w, preferred_element_type=jnp.float32) + bias)
    # (bb*lc_pad, Dp) f32; rows [i*lc_pad, i*lc_pad+Lc) are the real conv rows.

    # --- hoisted constants (built once per grid step) ---
    dn_nt = (((1,), (1,)), ((), ()))                 # A @ B.T
    dn_nn = (((1,), (0,)), ((), ()))                 # A @ B

    # banded window-pool matrix (L, Lc): pool[l, j] = 1  iff  l <= j < l + fw
    prow = lax.broadcasted_iota(jnp.int32, (L, Lc), 0)
    pcol = lax.broadcasted_iota(jnp.int32, (L, Lc), 1)
    pool = ((pcol >= prow) & (pcol < prow + fw)).astype(jnp.float32)

    ones_dp = jnp.ones((Lc, Dp), jnp.float32)

    # --- all-ap: per-element mean over the Lc conv rows, one selection matmul ---
    m = bb * lc_pad
    srow = lax.broadcasted_iota(jnp.int32, (bb, m), 0)
    scol = lax.broadcasted_iota(jnp.int32, (bb, m), 1)
    off = scol - srow * lc_pad
    msel = jnp.where((off >= 0) & (off < Lc), 1.0 / Lc, 0.0).astype(jnp.float32)
    a1_ref[0, :, :] = lax.dot_general(msel, c1_all, dn_nn,
                                      preferred_element_type=jnp.float32
                                      ).astype(a1_ref.dtype)
    a2_ref[0, :, :] = lax.dot_general(msel, c2_all, dn_nn,
                                      preferred_element_type=jnp.float32
                                      ).astype(a2_ref.dtype)

    # --- per-element attention matrix + attention-weighted w-ap pooling ---
    for i in range(bb):
        r0 = i * lc_pad
        c1 = c1_all[r0:r0 + Lc, :]                   # (Lc, Dp) f32
        c2 = c2_all[r0:r0 + Lc, :]

        # bf16 copies for the MXU cross term; squared norms from the SAME rounded
        # values so d2 is a consistent (non-negative) squared distance.
        c1b = c1.astype(jnp.bfloat16)
        c2b = c2.astype(jnp.bfloat16)
        c1q = c1b.astype(jnp.float32)
        c2q = c2b.astype(jnp.float32)

        sq1 = jnp.sum(c1q * c1q, axis=-1, keepdims=True)                # (Lc, 1)
        sq2_cols = lax.dot_general(ones_dp, c2q * c2q, dn_nt,
                                   preferred_element_type=jnp.float32)  # (Lc, Lc) col j = ||c2_j||^2
        cross = lax.dot_general(c1b, c2b, dn_nt,
                                preferred_element_type=jnp.float32)     # (Lc, Lc)
        d2 = jnp.maximum(sq1 + sq2_cols - 2.0 * cross, 0.0)
        a_mat = 1.0 / (1.0 + jnp.sqrt(d2))                              # A12, (Lc, Lc)

        attn1 = jnp.sum(a_mat, axis=1, keepdims=True)                   # (Lc, 1) row sums
        attn2 = jnp.sum(a_mat, axis=0, keepdims=True)                   # (1, Lc) col sums == A12^T @ 1

        # w-ap pooling as a single matmul per sentence; attn2 is folded into the
        # banded matrix so no transpose / shifted-slice adds are needed.
        w1_ref[0, i * L:(i + 1) * L, :] = lax.dot_general(
            pool, attn1 * c1, dn_nn,
            preferred_element_type=jnp.float32).astype(w1_ref.dtype)
        w2_ref[0, i * L:(i + 1) * L, :] = lax.dot_general(
            pool * attn2, c2, dn_nn,
            preferred_element_type=jnp.float32).astype(w2_ref.dtype)


def abcnn2_block(x1, x2, conv_w, conv_b, filter_width, block_b=None):
    """x1, x2: (B, 1, L, D_in) float32 (PyTorch NCHW layout).

    Returns (w1, w2, a1, a2) with shapes
      w1, w2: (B, 1, L, D_out)   a1, a2: (B, D_out)
    """
    B, _, L, D_in = x1.shape
    fw = filter_width
    D_out = conv_w.shape[-1]
    pad = fw - 1
    Lc = L + fw - 1                     # wide-conv output length
    K = fw * D_in

    lc_pad = _round_up(Lc, 8)
    Kp = _round_up(K, 128)
    Dp = _round_up(D_out, 128)

    bb = block_b if block_b is not None else _choose_block_b(B, lc_pad, Kp, Dp, L)
    nb = pl.cdiv(B, bb)
    B_pad = nb * bb

    def im2col(x):
        xp = jnp.pad(x[:, 0], ((0, 0), (pad, pad), (0, 0)))             # (B, L+2p, D_in)
        xu = jnp.concatenate([xp[:, k:k + Lc, :] for k in range(fw)], axis=-1)  # (B, Lc, K)
        xu = jnp.pad(xu, ((0, B_pad - B), (0, lc_pad - Lc), (0, Kp - K)))
        return xu.reshape(nb, bb * lc_pad, Kp).astype(jnp.bfloat16)

    x1u = im2col(x1)
    x2u = im2col(x2)

    # conv params: W[k, d_in, d_out] (torch Conv2d weight[d_out, 0, k, d_in]) with
    # the taps folded into the contraction dim, zero-padded to lane-dense shapes.
    w_flat = jnp.pad(conv_w.reshape(K, D_out),
                     ((0, Kp - K), (0, Dp - D_out))).astype(jnp.bfloat16)
    bias = jnp.pad(conv_b, (0, Dp - D_out)).reshape(1, Dp).astype(jnp.float32)

    kernel = functools.partial(_abcnn2_kernel, bb=bb, fw=fw, seq_len=L,
                               lc=Lc, lc_pad=lc_pad)

    out_shape = (
        jax.ShapeDtypeStruct((nb, bb * L, Dp), jnp.float32),
        jax.ShapeDtypeStruct((nb, bb * L, Dp), jnp.float32),
        jax.ShapeDtypeStruct((nb, bb, Dp), jnp.float32),
        jax.ShapeDtypeStruct((nb, bb, Dp), jnp.float32),
    )

    w1, w2, a1, a2 = pl.pallas_call(
        kernel,
        out_shape=out_shape,
        grid=(nb,),
        in_specs=[
            pl.BlockSpec((1, bb * lc_pad, Kp), lambda g: (g, 0, 0)),
            pl.BlockSpec((1, bb * lc_pad, Kp), lambda g: (g, 0, 0)),
            pl.BlockSpec((Kp, Dp), lambda g: (0, 0)),
            pl.BlockSpec((1, Dp), lambda g: (0, 0)),
        ],
        out_specs=(
            pl.BlockSpec((1, bb * L, Dp), lambda g: (g, 0, 0)),
            pl.BlockSpec((1, bb * L, Dp), lambda g: (g, 0, 0)),
            pl.BlockSpec((1, bb, Dp), lambda g: (g, 0, 0)),
            pl.BlockSpec((1, bb, Dp), lambda g: (g, 0, 0)),
        ),
        compiler_params=pltpu.CompilerParams(
            dimension_semantics=("parallel",)),
    )(x1u, x2u, w_flat, bias)

    # strip padding, back to PyTorch layout; dropout == identity (eval mode)
    w1 = w1.reshape(B_pad, L, Dp)[:B, :, :D_out]
    w2 = w2.reshape(B_pad, L, Dp)[:B, :, :D_out]
    a1 = a1.reshape(B_pad, Dp)[:B, :D_out]
    a2 = a2.reshape(B_pad, Dp)[:B, :D_out]
    return w1[:, None], w2[:, None], a1, a2


def abcnn2_reference(x1, x2, conv_w, conv_b, filter_width):
    """Pure-JAX f32 reference with identical semantics (channels-last)."""
    B, _, L, D_in = x1.shape
    fw = filter_width
    D_out = conv_w.shape[-1]
    Lc = L + fw - 1
    pad = fw - 1

    def conv(x):
        xp = jnp.pad(x[:, 0], ((0, 0), (pad, pad), (0, 0)))
        acc = jnp.zeros((B, Lc, D_out), jnp.float32)
        for k in range(fw):
            acc = acc + jnp.einsum('bld,do->blo', xp[:, k:k + Lc, :], conv_w[k])
        return jnp.tanh(acc + conv_b.reshape(1, 1, D_out))

    c1, c2 = conv(x1), conv(x2)
    d2 = (jnp.sum(c1 ** 2, -1)[:, :, None] + jnp.sum(c2 ** 2, -1)[:, None, :]
          - 2.0 * jnp.einsum('bid,bjd->bij', c1, c2))
    A = 1.0 / (1.0 + jnp.sqrt(jnp.maximum(d2, 0.0)))
    attn1 = jnp.sum(A, axis=2)          # (B, Lc)
    attn2 = jnp.sum(A, axis=1)          # (B, Lc)
    wc1 = attn1[..., None] * c1
    wc2 = attn2[..., None] * c2
    w1 = sum(wc1[:, k:k + L, :] for k in range(fw))
    w2 = sum(wc2[:, k:k + L, :] for k in range(fw))
    a1 = jnp.mean(c1, axis=1)
    a2 = jnp.mean(c2, axis=1)
    return w1[:, None], w2[:, None], a1, a2


if __name__ == "__main__":
    B, L, D_in, D_out, FW = 2, 8, 32, 16, 3

    key = jax.random.PRNGKey(0)
    k1, k2, kw, kb = jax.random.split(key, 4)
    x1 = jax.random.normal(k1, (B, 1, L, D_in), dtype=jnp.float32)
    x2 = jax.random.normal(k2, (B, 1, L, D_in), dtype=jnp.float32)
    conv_w = 0.1 * jax.random.normal(kw, (FW, D_in, D_out), dtype=jnp.float32)
    conv_b = 0.1 * jax.random.normal(kb, (D_out,), dtype=jnp.float32)

    w1, w2, a1, a2 = abcnn2_block(x1, x2, conv_w, conv_b, FW)
    jax.block_until_ready((w1, w2, a1, a2))

    rw1, rw2, ra1, ra2 = abcnn2_reference(x1, x2, conv_w, conv_b, FW)
    assert w1.shape == (B, 1, L, D_out) and a1.shape == (B, D_out)
    # bf16 MXU operands -> looser tolerance than the pure-f32 reference
    for got, ref in ((w1, rw1), (w2, rw2), (a1, ra1), (a2, ra2)):
        assert jnp.allclose(got, ref, rtol=3e-2, atol=3e-2), "mismatch vs reference"

    print("KERNEL_OK")
</pallas_src>

<mosaic_0001>
module attributes {stable_mosaic.version = 11 : i64} {
  func.func @_abcnn2_kernel(%arg0: i32, %arg1: memref<1x16x128xbf16, #tpu.memory_space<vmem>>, %arg2: memref<1x16x128xbf16, #tpu.memory_space<vmem>>, %arg3: memref<128x128xbf16, #tpu.memory_space<vmem>>, %arg4: memref<1x128xf32, #tpu.memory_space<vmem>>, %arg5: memref<1x8x128xf32, #tpu.memory_space<vmem>>, %arg6: memref<1x8x128xf32, #tpu.memory_space<vmem>>, %arg7: memref<1x1x128xf32, #tpu.memory_space<vmem>>, %arg8: memref<1x1x128xf32, #tpu.memory_space<vmem>>) attributes {dimension_semantics = [#tpu.dimension_semantics<parallel>], iteration_bounds = array<i64: 2>, scalar_prefetch = 0 : i64, scratch_operands = 0 : i64, tpu.core_type = #tpu.core_type<tc>, window_params = [{transform_indices = @transform_0, window_bounds = array<i64: 1, 16, 128>}, {transform_indices = @transform_1, window_bounds = array<i64: 1, 16, 128>}, {pipeline_mode = #tpu.pipeline_mode<synchronous>, transform_indices = @transform_2, window_bounds = array<i64: 128, 128>}, {pipeline_mode = #tpu.pipeline_mode<synchronous>, transform_indices = @transform_3, window_bounds = array<i64: 1, 128>}, {transform_indices = @transform_4, window_bounds = array<i64: 1, 8, 128>}, {transform_indices = @transform_5, window_bounds = array<i64: 1, 8, 128>}, {transform_indices = @transform_6, window_bounds = array<i64: 1, 1, 128>}, {transform_indices = @transform_7, window_bounds = array<i64: 1, 1, 128>}]} {
    %c0 = arith.constant 0 : index
    %c0_0 = arith.constant 0 : index
    %0 = vector.load %arg3[%c0, %c0_0] : memref<128x128xbf16, #tpu.memory_space<vmem>>, vector<128x128xbf16>
    %c0_1 = arith.constant 0 : index
    %c0_2 = arith.constant 0 : index
    %1 = vector.load %arg4[%c0_1, %c0_2] : memref<1x128xf32, #tpu.memory_space<vmem>>, vector<1x128xf32>
    %c0_3 = arith.constant 0 : index
    %c0_4 = arith.constant 0 : index
    %c0_5 = arith.constant 0 : index
    %2 = vector.load %arg1[%c0_3, %c0_4, %c0_5] : memref<1x16x128xbf16, #tpu.memory_space<vmem>>, vector<1x16x128xbf16>
    %3 = vector.shape_cast %2 : vector<1x16x128xbf16> to vector<16x128xbf16>
    %cst = arith.constant dense<0.000000e+00> : vector<16x128xf32>
    %4 = tpu.matmul %3, %0, %cst {dimension_numbers = #tpu.dot_dimension_numbers<[1], [0], [0], [1], [0, 0, 1, 1], [], []>} : vector<16x128xbf16>, vector<128x128xbf16>, vector<16x128xf32> -> vector<16x128xf32>
    %5 = vector.broadcast %1 : vector<1x128xf32> to vector<16x128xf32>
    %6 = arith.addf %4, %5 : vector<16x128xf32>
    %7 = math.tanh %6 : vector<16x128xf32>
    %c0_6 = arith.constant 0 : index
    %c0_7 = arith.constant 0 : index
    %c0_8 = arith.constant 0 : index
    %8 = vector.load %arg2[%c0_6, %c0_7, %c0_8] : memref<1x16x128xbf16, #tpu.memory_space<vmem>>, vector<1x16x128xbf16>
    %9 = vector.shape_cast %8 : vector<1x16x128xbf16> to vector<16x128xbf16>
    %cst_9 = arith.constant dense<0.000000e+00> : vector<16x128xf32>
    %10 = tpu.matmul %9, %0, %cst_9 {dimension_numbers = #tpu.dot_dimension_numbers<[1], [0], [0], [1], [0, 0, 1, 1], [], []>} : vector<16x128xbf16>, vector<128x128xbf16>, vector<16x128xf32> -> vector<16x128xf32>
    %11 = vector.broadcast %1 : vector<1x128xf32> to vector<16x128xf32>
    %12 = arith.addf %10, %11 : vector<16x128xf32>
    %13 = math.tanh %12 : vector<16x128xf32>
    %14 = tpu.iota {dimensions = array<i32: 0>} : vector<8x10xi32>
    %15 = tpu.iota {dimensions = array<i32: 1>} : vector<8x10xi32>
    %16 = arith.cmpi sge, %15, %14 : vector<8x10xi32>
    %c3_i32 = arith.constant 3 : i32
    %17 = vector.broadcast %c3_i32 : i32 to vector<8x10xi32>
    %18 = arith.addi %14, %17 : vector<8x10xi32>
    %19 = arith.cmpi slt, %15, %18 : vector<8x10xi32>
    %20 = arith.andi %16, %19 : vector<8x10xi1>
    %21 = arith.extui %20 : vector<8x10xi1> to vector<8x10xi32>
    %22 = arith.sitofp %21 : vector<8x10xi32> to vector<8x10xf32>
    %cst_10 = arith.constant 1.000000e+00 : f32
    %23 = vector.broadcast %cst_10 : f32 to vector<10x128xf32>
    %24 = tpu.iota {dimensions = array<i32: 0>} : vector<1x16xi32>
    %25 = tpu.iota {dimensions = array<i32: 1>} : vector<1x16xi32>
    %c16_i32 = arith.constant 16 : i32
    %26 = vector.broadcast %c16_i32 : i32 to vector<1x16xi32>
    %27 = arith.muli %24, %26 : vector<1x16xi32>
    %28 = arith.subi %25, %27 : vector<1x16xi32>
    %c0_i32 = arith.constant 0 : i32
    %29 = vector.broadcast %c0_i32 : i32 to vector<1x16xi32>
    %30 = arith.cmpi sge, %28, %29 : vector<1x16xi32>
    %c10_i32 = arith.constant 10 : i32
    %31 = vector.broadcast %c10_i32 : i32 to vector<1x16xi32>
    %32 = arith.cmpi slt, %28, %31 : vector<1x16xi32>
    %33 = arith.andi %30, %32 : vector<1x16xi1>
    %cst_11 = arith.constant 1.000000e-01 : f32
    %cst_12 = arith.constant 0.000000e+00 : f32
    %34 = vector.broadcast %cst_11 : f32 to vector<1x16xf32>
    %35 = vector.broadcast %cst_12 : f32 to vector<1x16xf32>
    %36 = arith.select %33, %34, %35 : vector<1x16xi1>, vector<1x16xf32>
    %cst_13 = arith.constant dense<0.000000e+00> : vector<1x128xf32>
    %37 = tpu.matmul %36, %7, %cst_13 {dimension_numbers = #tpu.dot_dimension_numbers<[1], [0], [0], [1], [0, 0, 1, 1], [], []>} : vector<1x16xf32>, vector<16x128xf32>, vector<1x128xf32> -> vector<1x128xf32>
    %c0_14 = arith.constant 0 : index
    %c0_15 = arith.constant 0 : index
    %c0_16 = arith.constant 0 : index
    %38 = vector.load %arg7[%c0_14, %c0_15, %c0_16] : memref<1x1x128xf32, #tpu.memory_space<vmem>>, vector<1x1x128xf32>
    %39 = vector.shape_cast %38 : vector<1x1x128xf32> to vector<1x128xf32>
    %40 = vector.shape_cast %37 : vector<1x128xf32> to vector<1x1x128xf32>
    tpu.vector_store %arg7[%c0_14, %c0_15, %c0_16], %40 {strides = array<i32>} : memref<1x1x128xf32, #tpu.memory_space<vmem>>, vector<1x1x128xf32>,
    %cst_17 = arith.constant dense<0.000000e+00> : vector<1x128xf32>
    %41 = tpu.matmul %36, %13, %cst_17 {dimension_numbers = #tpu.dot_dimension_numbers<[1], [0], [0], [1], [0, 0, 1, 1], [], []>} : vector<1x16xf32>, vector<16x128xf32>, vector<1x128xf32> -> vector<1x128xf32>
    %c0_18 = arith.constant 0 : index
    %c0_19 = arith.constant 0 : index
    %c0_20 = arith.constant 0 : index
    %42 = vector.load %arg8[%c0_18, %c0_19, %c0_20] : memref<1x1x128xf32, #tpu.memory_space<vmem>>, vector<1x1x128xf32>
    %43 = vector.shape_cast %42 : vector<1x1x128xf32> to vector<1x128xf32>
    %44 = vector.shape_cast %41 : vector<1x128xf32> to vector<1x1x128xf32>
    tpu.vector_store %arg8[%c0_18, %c0_19, %c0_20], %44 {strides = array<i32>} : memref<1x1x128xf32, #tpu.memory_space<vmem>>, vector<1x1x128xf32>,
    %45 = vector.extract_strided_slice %7 {offsets = [0, 0], sizes = [10, 128], strides = [1, 1]} : vector<16x128xf32> to vector<10x128xf32>
    %46 = vector.extract_strided_slice %13 {offsets = [0, 0], sizes = [10, 128], strides = [1, 1]} : vector<16x128xf32> to vector<10x128xf32>
    %47 = arith.truncf %45 : vector<10x128xf32> to vector<10x128xbf16>
    %48 = arith.truncf %46 : vector<10x128xf32> to vector<10x128xbf16>
    %49 = arith.extf %47 : vector<10x128xbf16> to vector<10x128xf32>
    %50 = arith.extf %48 : vector<10x128xbf16> to vector<10x128xf32>
    %51 = arith.mulf %49, %49 : vector<10x128xf32>
    %cst_21 = arith.constant dense<0.000000e+00> : vector<10xf32>
    %52 = vector.multi_reduction <add>, %51, %cst_21 [1] : vector<10x128xf32> to vector<10xf32>
    %53 = vector.shape_cast %52 : vector<10xf32> to vector<10x1xf32>
    %54 = arith.mulf %50, %50 : vector<10x128xf32>
    %cst_22 = arith.constant dense<0.000000e+00> : vector<10x10xf32>
    %55 = tpu.matmul %23, %54, %cst_22 {dimension_numbers = #tpu.dot_dimension_numbers<[1], [1], [0], [0], [0, 0, 1, 0], [], []>} : vector<10x128xf32>, vector<10x128xf32>, vector<10x10xf32> -> vector<10x10xf32>
    %cst_23 = arith.constant dense<0.000000e+00> : vector<10x10xf32>
    %56 = tpu.matmul %47, %48, %cst_23 {dimension_numbers = #tpu.dot_dimension_numbers<[1], [1], [0], [0], [0, 0, 1, 0], [], []>} : vector<10x128xbf16>, vector<10x128xbf16>, vector<10x10xf32> -> vector<10x10xf32>
    %57 = vector.broadcast %53 : vector<10x1xf32> to vector<10x10xf32>
    %58 = arith.addf %57, %55 : vector<10x10xf32>
    %cst_24 = arith.constant 2.000000e+00 : f32
    %59 = vector.broadcast %cst_24 : f32 to vector<10x10xf32>
    %60 = arith.mulf %59, %56 : vector<10x10xf32>
    %61 = arith.subf %58, %60 : vector<10x10xf32>
    %cst_25 = arith.constant 0.000000e+00 : f32
    %62 = vector.broadcast %cst_25 : f32 to vector<10x10xf32>
    %63 = arith.maximumf %61, %62 : vector<10x10xf32>
    %64 = math.sqrt %63 : vector<10x10xf32>
    %cst_26 = arith.constant 1.000000e+00 : f32
    %65 = vector.broadcast %cst_26 : f32 to vector<10x10xf32>
    %66 = arith.addf %65, %64 : vector<10x10xf32>
    %cst_27 = arith.constant 1.000000e+00 : f32
    %67 = vector.broadcast %cst_27 : f32 to vector<10x10xf32>
    %68 = arith.divf %67, %66 : vector<10x10xf32>
    %cst_28 = arith.constant dense<0.000000e+00> : vector<10xf32>
    %69 = vector.multi_reduction <add>, %68, %cst_28 [1] : vector<10x10xf32> to vector<10xf32>
    %70 = vector.shape_cast %69 : vector<10xf32> to vector<10x1xf32>
    %cst_29 = arith.constant dense<0.000000e+00> : vector<10xf32>
    %71 = vector.multi_reduction <add>, %68, %cst_29 [0] : vector<10x10xf32> to vector<10xf32>
    %72 = vector.shape_cast %71 : vector<10xf32> to vector<1x10xf32>
    %73 = vector.broadcast %70 : vector<10x1xf32> to vector<10x128xf32>
    %74 = arith.mulf %73, %45 : vector<10x128xf32>
    %cst_30 = arith.constant dense<0.000000e+00> : vector<8x128xf32>
    %75 = tpu.matmul %22, %74, %cst_30 {dimension_numbers = #tpu.dot_dimension_numbers<[1], [0], [0], [1], [0, 0, 1, 1], [], []>} : vector<8x10xf32>, vector<10x128xf32>, vector<8x128xf32> -> vector<8x128xf32>
    %c0_31 = arith.constant 0 : index
    %c0_32 = arith.constant 0 : index
    %c0_33 = arith.constant 0 : index
    %76 = vector.load %arg5[%c0_31, %c0_32, %c0_33] : memref<1x8x128xf32, #tpu.memory_space<vmem>>, vector<1x8x128xf32>
    %77 = vector.shape_cast %76 : vector<1x8x128xf32> to vector<8x128xf32>
    %78 = vector.shape_cast %75 : vector<8x128xf32> to vector<1x8x128xf32>
    tpu.vector_store %arg5[%c0_31, %c0_32, %c0_33], %78 {strides = array<i32>} : memref<1x8x128xf32, #tpu.memory_space<vmem>>, vector<1x8x128xf32>,
    %79 = vector.broadcast %72 : vector<1x10xf32> to vector<8x10xf32>
    %80 = arith.mulf %22, %79 : vector<8x10xf32>
    %cst_34 = arith.constant dense<0.000000e+00> : vector<8x128xf32>
    %81 = tpu.matmul %80, %46, %cst_34 {dimension_numbers = #tpu.dot_dimension_numbers<[1], [0], [0], [1], [0, 0, 1, 1], [], []>} : vector<8x10xf32>, vector<10x128xf32>, vector<8x128xf32> -> vector<8x128xf32>
    %c0_35 = arith.constant 0 : index
    %c0_36 = arith.constant 0 : index
    %c0_37 = arith.constant 0 : index
    %82 = vector.load %arg6[%c0_35, %c0_36, %c0_37] : memref<1x8x128xf32, #tpu.memory_space<vmem>>, vector<1x8x128xf32>
    %83 = vector.shape_cast %82 : vector<1x8x128xf32> to vector<8x128xf32>
    %84 = vector.shape_cast %81 : vector<8x128xf32> to vector<1x8x128xf32>
    tpu.vector_store %arg6[%c0_35, %c0_36, %c0_37], %84 {strides = array<i32>} : memref<1x8x128xf32, #tpu.memory_space<vmem>>, vector<1x8x128xf32>,
    return
  }
  func.func @transform_0(%arg0: i32) -> (i32, i32, i32) {
    %c0_i32 = arith.constant 0 : i32
    %c0_i32_0 = arith.constant 0 : i32
    %c0_i32_1 = arith.constant 0 : i32
    return %arg0, %c0_i32, %c0_i32_0 : i32, i32, i32
  }
  func.func @transform_1(%arg0: i32) -> (i32, i32, i32) {
    %c0_i32 = arith.constant 0 : i32
    %c0_i32_0 = arith.constant 0 : i32
    %c0_i32_1 = arith.constant 0 : i32
    return %arg0, %c0_i32, %c0_i32_0 : i32, i32, i32
  }
  func.func @transform_2(%arg0: i32) -> (i32, i32) {
    %c0_i32 = arith.constant 0 : i32
    %c0_i32_0 = arith.constant 0 : i32
    %c0_i32_1 = arith.constant 0 : i32
    return %c0_i32, %c0_i32_0 : i32, i32
  }
  func.func @transform_3(%arg0: i32) -> (i32, i32) {
    %c0_i32 = arith.constant 0 : i32
    %c0_i32_0 = arith.constant 0 : i32
    %c0_i32_1 = arith.constant 0 : i32
    return %c0_i32, %c0_i32_0 : i32, i32
  }
  func.func @transform_4(%arg0: i32) -> (i32, i32, i32) {
    %c0_i32 = arith.constant 0 : i32
    %c0_i32_0 = arith.constant 0 : i32
    %c0_i32_1 = arith.constant 0 : i32
    return %arg0, %c0_i32, %c0_i32_0 : i32, i32, i32
  }
  func.func @transform_5(%arg0: i32) -> (i32, i32, i32) {
    %c0_i32 = arith.constant 0 : i32
    %c0_i32_0 = arith.constant 0 : i32
    %c0_i32_1 = arith.constant 0 : i32
    return %arg0, %c0_i32, %c0_i32_0 : i32, i32, i32
  }
  func.func @transform_6(%arg0: i32) -> (i32, i32, i32) {
    %c0_i32 = arith.constant 0 : i32
    %c0_i32_0 = arith.constant 0 : i32
    %c0_i32_1 = arith.constant 0 : i32
    return %arg0, %c0_i32, %c0_i32_0 : i32, i32, i32
  }
  func.func @transform_7(%arg0: i32) -> (i32, i32, i32) {
    %c0_i32 = arith.constant 0 : i32
    %c0_i32_0 = arith.constant 0 : i32
    %c0_i32_1 = arith.constant 0 : i32
    return %arg0, %c0_i32, %c0_i32_0 : i32, i32, i32
  }
}

</mosaic_0001>

<bundles_post_ra>
// kernel: tpu_custom_call.1
= control target key start
LH: loop header
LB: loop body
LE: loop exit
PB: predicated region body
PF: predicated region fallthrough
CT: control target
= control target key end

     0   :  { %s2347_s0 = inlined_call_operand.hbm [shape: bf16[2,16,128], index: 0, kind: input, shape index: {}]   ;;  %s2348_s1 = inlined_call_operand.hbm [shape: bf16[2,16,128], index: 1, kind: input, shape index: {}]   ;;  %s2349_s2 = inlined_call_operand.hbm [shape: bf16[128,128], index: 2, kind: input, shape index: {}]   ;;  %s2350_s3 = inlined_call_operand.vmem [shape: f32[1,128], index: 3, kind: input, shape index: {}]   ;;  %s2351_s4 = inlined_call_operand.hbm [shape: f32[2,8,128], index: 4, kind: output, shape index: {0}]   ;;  %s2352_s5 = inlined_call_operand.hbm [shape: f32[2,8,128], index: 5, kind: output, shape index: {1}]   ;;  %s2353_s6 = inlined_call_operand.hbm [shape: f32[2,1,128], index: 6, kind: output, shape index: {2}]   ;;  %s2354_s7 = inlined_call_operand.hbm [shape: f32[2,1,128], index: 7, kind: output, shape index: {3}]  }
   0x1   :  { %2367 = sst [smem:[#allocation24_spill]] %s2347_s0 }
   0x2   :  { %2368 = sst [smem:[#allocation25_spill]] %s2349_s2 }
   0x3   :  { %13 = vsyncpa [#allocation3], 0 }
   0x4   :  { %15 = vsyncpa [#allocation3 + $0x1], 0 }
   0x5   :  { %16 = vsyncpa [#allocation6], 0 }
   0x6   :  { %18 = vsyncpa [#allocation6 + $0x1], 0 }
   0x7   :  { %19 = vsyncpa [#allocation4], 0 }
   0x8   :  { %21 = vsyncpa [#allocation4 + $0x1], 0 }
   0x9   :  { %22 = vsyncpa [#allocation10], 0 }
   0xa   :  { %24 = vsyncpa [#allocation10 + $0x1], 0 }
   0xb   :  { %25 = vsyncpa [#allocation13], 0 }
   0xc   :  { %27 = vsyncpa [#allocation13 + $0x1], 0  ;;  %s1897_s24 = smov 0   ;;  %s1899_s25 = smov 0  }
   0xd   :  { %s1901_s26 = smov 0   ;;  %s1903_s27 = smov 0  }
   0xe LB: > { %2369 = sst [smem:[#allocation20_spill]] %s1837_s26  ;;  %s1918_s28 = sadd.s32 4294967295, %s1841_s27   ;;  %s1841_s27 = sphi %s1903_s27, %s2392_s27   ;;  %s1837_s26 = sphi %s1901_s26, %s2394_s26   ;;  %s1833_s25 = sphi %s1899_s25, %s2396_s25   ;;  %s1829_s24 = sphi %s1897_s24, %s2395_s24  }
   0xf   : > { %s2358_s29 = sadd.s32 4294967294, %s1841_s27   ;;  %p53_p0 = scmp.ne.s32.totalorder %s1833_s25, %s1829_s24 }
  0x10   : > { %p2355_p1 = scmp.eq.s32.totalorder %s1918_s28, 0  ;;  %p151_p3 = scmp.eq.s32.totalorder %s2358_s29, 1 }
  0x11   : > { %p1299_p5 = scmp.ge.s32.totalorder %s1841_s27, 1  ;;  %p236_p7 = scmp.lt.s32.totalorder %s1841_s27, 3 }
  0x12   : > { %p1929_p4 = por %p2355_p1, %p53_p0  ;;  %p1934_p6 = por %p151_p3, %p53_p0 }
  0x13   : > { %p1939_p8 = pnand %p1299_p5, %p236_p7  ;;  %s1843_s10 = smov [#allocation7]  }
  0x14   : > { %s2370_s30 = scalar_select %p1929_p4, 1, 0 }
  0x15   : > { %s2371_s8 = scalar_select %p1934_p6, 1, 0 }
  0x16   : > { %s2373_s9 = scalar_select %p1939_p8, 1, 0 }
  0x17   : > { %2372 = sst [smem:[#allocation21_spill]] %s2371_s8  ;;  %s248_s11 = sshll.u32 %s1843_s10, 4  ;;  %s1943_s11 = int_to_ptr.vmem [resolvable:$true] %s248_s11 }
  0x18   : > { %p1493_p9 = pneg %p1939_p8  ;;  %s1955_s13 = sadd.s32 1, %s1841_s27  }
  0x19   : > { %2375 = sst [smem:[#allocation22_spill]] %s1955_s13  ;;  %s40_s14 = sadd.s32 1, %s1837_s26 }
  0x1a   : > { %p1950_p11 = pnand %p1493_p9, %p2355_p1  ;;  %s37_s15 = ssub.s32 %s1841_s27, %s1955_s13 }
  0x1b   : > { %s2376_s2 = sld [smem:[#allocation25_spill]] }
  0x1c   : > { %p1589_p13 = pneg %p1950_p11 }
  0x21   : > { %s1587_s18 = scalar_lea.hbm %s2376_s2, 1024 }
  0x22   : > { %p1588_p12 = scmp.ne.s32.totalorder %s2376_s2, %s1587_s18  ;;  %p1594_p5 = scmp.lt.u32.totalorder %s1587_s18, %s2376_s2 }
  0x24   : > { %p1590_p0 = pnand %p1589_p13, %p1588_p12 }
  0x26   : > { %p1591_p3 = pneg %p1590_p0 }
  0x28   : > { %p1596_p7 = pnand %p1594_p5, %p1591_p3 }
  0x2a   : > { %1599 = shalt.err (!%p1596_p7)
}
  0x2b   : > { %s1600_s23 = scalar_lea.vmem %s1943_s11, 1024  ;;  %p1608_p2 = scmp.lt.s32.totalorder %s1943_s11, %s1943_s11 }
  0x2c   : > { %p1601_p9 = scmp.ne.s32.totalorder %s1943_s11, %s1600_s23  ;;  %p1609_p6 = scmp.lt.s32.totalorder %s1600_s23, %s1600_s23 }
  0x2e   : > { %p1603_p10 = pnand %p1601_p9, %p1589_p13  ;;  %p1610_p4 = por %p1609_p6, %p1608_p2 }
  0x30   : > { %p1604_p1 = pneg %p1603_p10 }
  0x32   : > { %p1611_p8 = pnand %p1610_p4, %p1604_p1 }
  0x34   : > { %1614 = shalt.err (!%p1611_p8)
}
  0x35   : > { %s2359_s10 = smov 64   ;;  %s2361_s16 = smov 4  }
  0x36   : > { %1496 = dma.hbm_to_vmem [thread:$0]  (!%p1950_p11), %s2376_s2, 1024, %s1943_s11, [#allocation6], %s2359_s10, %s2359_s10, %s2361_s16  }
  0x37   : > { %p38_p1 = scmp.eq.s32.totalorder %s37_s15, 0  ;;  %p47_p2 = scmp.ne.s32.totalorder %s1837_s26, %s1833_s25 }
  0x38   : > { %p48_p4 = scmp.eq.s32.totalorder %s1841_s27, 0  ;;  %p1518_p6 = scmp.lt.s32.totalorder %s1841_s27, 2 }
  0x39   : > { %s1989_s19 = scalar_select %p38_p1, %s1837_s26, %s40_s14  }
  0x3a   : > { %p49_p8 = por %p48_p4, %p47_p2  ;;  %p2378_p10 = scmp.eq.s32.totalorder %s1918_s28, 1 }
  0x3b   : > { %2377 = sst [smem:[#allocation23_spill]] %s1989_s19  ;;  %s265_s12 = sand.u32 1, %s1837_s26  }
  0x3c   : > { %p1993_p12 = por %p2378_p10, %p47_p2  ;;  %s1340_s21 = sshll.u32 %s1841_s27, 7 }
  0x3d   : > { %s1999_s22 = sshll.u32 %s265_s12, 3  ;;  %s2380_s0 = sld [smem:[#allocation24_spill]] }
  0x3e   : > { %s269_s14 = scalar_lea.vmem [#allocation2], %s1999_s22  ;;  %p2007_p11 = pnand %p1518_p6, %p49_p8 }
  0x3f   : > { %s276_s15 = sshll.u32 %s269_s14, 4  ;;  %s2016_s29 = scalar_lea.hbm %s2348_s1, %s1340_s21  ;;  %s2011_s15 = int_to_ptr.vmem [resolvable:$true] %s276_s15 }
  0x40   : > { %s2018_s23 = scalar_lea.sflag [#allocation3], %s265_s12  ;;  %p1617_p0 = pneg %p2007_p11 }
  0x43   : > { %s2004_s11 = scalar_lea.hbm %s2380_s0, %s1340_s21  ;;  %s1620_s19 = scalar_lea.hbm %s2380_s0, 256 }
  0x44   : > { %s1615_s16 = scalar_lea.hbm %s2004_s11, 128  ;;  %p1621_p7 = scmp.lt.u32.totalorder %s2004_s11, %s2380_s0 }
  0x45   : > { %p1616_p13 = scmp.ne.s32.totalorder %s2004_s11, %s1615_s16  ;;  %p1622_p9 = scmp.lt.u32.totalorder %s1620_s19, %s1615_s16 }
  0x46   : > { %p1624_p2 = scmp.lt.u32.totalorder %s1615_s16, %s2004_s11 }
  0x47   : > { %p1618_p3 = pnand %p1617_p0, %p1616_p13  ;;  %p1623_p1 = por %p1622_p9, %p1621_p7 }
  0x49   : > { %p1619_p5 = pneg %p1618_p3  ;;  %p1625_p4 = por %p1624_p2, %p1623_p1 }
  0x4b   : > { %p1626_p6 = pnand %p1625_p4, %p1619_p5 }
  0x4d   : > { %1629 = shalt.err (!%p1626_p6)
}
  0x4e   : > { %s1630_s10 = scalar_lea.vmem %s2011_s15, 128  ;;  %s1846_s2 = smov [#allocation2]  }
  0x4f   : > { %p1631_p8 = scmp.ne.s32.totalorder %s2011_s15, %s1630_s10  ;;  %s1635_s12 = sshll.u32 %s1846_s2, 4  ;;  %s1636_s12 = int_to_ptr.vmem [resolvable:$false] %s1635_s12 }
  0x50   : > { %s1637_s26 = scalar_lea.vmem %s1636_s12, 256  ;;  %p1638_p3 = scmp.lt.s32.totalorder %s2011_s15, %s1636_s12 }
  0x51   : > { %p1633_p10 = pnand %p1631_p8, %p1617_p0  ;;  %p1639_p7 = scmp.lt.s32.totalorder %s1637_s26, %s1630_s10 }
  0x53   : > { %p1634_p13 = pneg %p1633_p10  ;;  %p1640_p9 = por %p1639_p7, %p1638_p3 }
  0x55   : > { %p1641_p1 = pnand %p1640_p9, %p1634_p13 }
  0x57   : > { %1644 = shalt.err (!%p1641_p1)
}
  0x58   : > { %s2382_s13 = smov 4   ;;  %s2383_s16 = smov 64  }
  0x59   : > { %1500 = dma.hbm_to_vmem [thread:$0]  (!%p2007_p11), %s2004_s11, 128, %s2011_s15, %s2018_s23, %s2383_s16, %s2383_s16, %s2382_s13  }
  0x5a   : > { %s290_s19 = scalar_lea.vmem [#allocation5], %s1999_s22  ;;  %s286_s18 = sand.u32 1, %s1841_s27  }
  0x5b   : > { %s297_s21 = sshll.u32 %s290_s19, 4  ;;  %s2053_s14 = scalar_lea.sflag [#allocation6], %s286_s18  ;;  %s2051_s21 = int_to_ptr.vmem [resolvable:$true] %s297_s21 }
  0x5c   : > { %s1645_s10 = scalar_lea.hbm %s2016_s29, 128  ;;  %s1650_s26 = scalar_lea.hbm %s2348_s1, 256 }
  0x5d   : > { %p1646_p5 = scmp.ne.s32.totalorder %s2016_s29, %s1645_s10  ;;  %p1651_p6 = scmp.lt.u32.totalorder %s2016_s29, %s2348_s1 }
  0x5e   : > { %p1652_p8 = scmp.lt.u32.totalorder %s1650_s26, %s1645_s10  ;;  %p1654_p13 = scmp.lt.u32.totalorder %s1645_s10, %s2016_s29 }
  0x5f   : > { %p1648_p2 = pnand %p1646_p5, %p1617_p0 }
  0x60   : > { %p1653_p10 = por %p1652_p8, %p1651_p6 }
  0x61   : > { %p1649_p4 = pneg %p1648_p2 }
  0x62   : > { %p1655_p3 = por %p1654_p13, %p1653_p10 }
  0x64   : > { %p1656_p7 = pnand %p1655_p3, %p1649_p4 }
  0x66   : > { %1659 = shalt.err (!%p1656_p7)
}
  0x67   : > { %s1660_s22 = scalar_lea.vmem %s2051_s21, 128  ;;  %s1847_s11 = smov [#allocation5]  }
  0x68   : > { %p1661_p9 = scmp.ne.s32.totalorder %s2051_s21, %s1660_s22  ;;  %s1665_s15 = sshll.u32 %s1847_s11, 4  ;;  %s1666_s15 = int_to_ptr.vmem [resolvable:$false] %s1665_s15 }
  0x69   : > { %s1667_s0 = scalar_lea.vmem %s1666_s15, 256  ;;  %p1668_p2 = scmp.lt.s32.totalorder %s2051_s21, %s1666_s15 }
  0x6a   : > { %p1663_p1 = pnand %p1661_p9, %p1617_p0  ;;  %p1669_p6 = scmp.lt.s32.totalorder %s1667_s0, %s1660_s22 }
  0x6c   : > { %p1664_p5 = pneg %p1663_p1  ;;  %p1670_p8 = por %p1669_p6, %p1668_p2 }
  0x6e   : > { %p1671_p10 = pnand %p1670_p8, %p1664_p5 }
  0x70   : > { %1674 = shalt.err (!%p1671_p10)
}
  0x71   : > { %1503 = dma.hbm_to_vmem [thread:$0]  (!%p2007_p11), %s2016_s29, 128, %s2051_s21, %s2053_s14, %s2383_s16, %s2383_s16, %s2382_s13  }
  0x72   : > { %p2384_p0 = scmp.ne.s32.totalorder %s2373_s9, 0 }
  0x73   : > { %s2085_s8 = sand.u32 (!%p2384_p0), 1, %s1833_s25   ;;  %p2385_p4 = scmp.ne.s32.totalorder (!%p2384_p0), %s2370_s30, 0 }
  0x74   : > { %309 = sbr.rel (%p2384_p0) target bundleno = 1082 (0x43a), region = 36  ;;  %s2088_s23 = sshll.u32 (!%p2384_p0), %s2085_s8, 3 }
  0x75   : > { %s312_s17 = scalar_lea.sflag (!%p2384_p0), [#allocation3], %s2085_s8  ;;  %s315_s19 = scalar_lea.vmem (!%p2384_p0), [#allocation2], %s2088_s23 }
  0x7b   : > { %1804 = dma.done.wait (%p2385_p4), %s312_s17, 128  }
  0x7c   : > { %1806 = vsyncadd (%p2385_p4), %s312_s17, 4294967168  ;;  %s320_s9 = sand.u32 1, %s1918_s28   ;;  %s324_s13 = scalar_lea.vmem [#allocation5], %s2088_s23 }
  0x7d   : > { %s321_s29 = scalar_lea.sflag [#allocation6], %s320_s9 }
  0x7e   : > { %1808 = dma.done.wait (%p2385_p4), %s321_s29, 128  }
  0x7f   : > { %1810 = vsyncadd (%p2385_p4), %s321_s29, 4294967168  ;;  %p2386_p11 = scmp.eq.s32.totalorder %s1918_s28, 0 }
  0x81   : > { %1812 = dma.done.wait (%p2386_p11), [#allocation6], 1024   ;;  %p2387_p13 = pmov %p2386_p11 }
  0x82   : > { %v1848_v0 = vmov 0.0   ;;  %vm1849_vm0 = vmmov 0   ;;  %v1561_v1 = vld [vmem:[#allocation7] sm:$0xff]   ;;  %v1562_v2 = vld [vmem:[#allocation7 + $0x8] sm:$0xff]   ;;  %v1563_v3 = vld [vmem:[#allocation7 + $0x10] sm:$0xff]   ;;  %v1850_v11 = vmov 0.0|0.0   ;;  %v551_v12 = vlaneseq }
  0x83   : > { %1814 = vsyncadd (%p2387_p13), [#allocation6], 4294966272  ;;  %1378 = vmatprep.subr.bf16.mxu0 %v1848_v0  ;;  %1398 = vmatprep.subr.bf16.mxu1 %v1848_v0  ;;  %v1564_v4 = vld [vmem:[#allocation7 + $0x18] sm:$0xff]   ;;  %v1565_v5 = vld [vmem:[#allocation7 + $0x20] sm:$0xff]   ;;  %vm567_vm4 = vcmask 130048   ;;  %vm723_vm5 = vcmask 1041408  }
  0x84   : > { %1394 = vmatprep.mubr.msk.bf16.mxu0 %vm1849_vm0, %v1848_v0  ;;  %1414 = vmatprep.mubr.msk.bf16.mxu1 %vm1849_vm0, %v1848_v0  ;;  %v1566_v6 = vld [vmem:[#allocation7 + $0x28] sm:$0xff]   ;;  %v1567_v7 = vld [vmem:[#allocation7 + $0x30] sm:$0xff]   ;;  %v1568_v8 = vld [vmem:[#allocation7 + $0x38] sm:$0xff]   ;;  %v2141_v16 = vshrl.u32 %v551_v12, 7  ;;  %v2143_v27 = vand.u32 127, %v551_v12  ;;  %v1851_v46 = vmov 1.0  }
  0x85   : > { %1379 = vmatpush3.bf16.msra.mxu0 %v1561_v1  ;;  %1399 = vmatpush3.bf16.msra.mxu1 %v1561_v1  ;;  %v1569_v9 = vld [vmem:[%s315_s19] sm:$0xff]   ;;  %v1570_v10 = vld [vmem:[%s324_s13] sm:$0xff]   ;;  %s370_s21 = scalar_lea.vmem [#allocation11], %s2085_s8  ;;  %s376_s18 = scalar_lea.vmem [#allocation12], %s2085_s8  ;;  %vm873_vm10 = vcmask 80896   ;;  %vm877_vm11 = vcmask 74752  }
  0x86   : > { %1380 = vmatprep.subr.bf16.mxu0 %v1848_v0  ;;  %1400 = vmatprep.subr.bf16.mxu1 %v1848_v0  ;;  %v1314_v13 = vld [vmem:[%s2350_s3] ss:$0 sm:$0xff]  ;;  %v561_v28 = vmul.u32 16, %v2141_v16  ;;  %vm555_vm12 = vcmp.ge.s32.totalorder %v2143_v27, %v2141_v16  ;;  %vm1852_vm14 = vmmov 1   ;;  %s1111_s14 = sshll.u32 %s376_s18, 4  ;;  %s1336_s10 = sshll.u32 %s1918_s28, 4  ;;  %s2190_s14 = int_to_ptr.vmem [resolvable:$true] %s1111_s14 }
  0x87   : > { %vm1471_vm15 = vmpackc.low %vm723_vm5, %vm1852_vm14  ;;  %s1109_s26 = scalar_lea.hbm %s2354_s7, %s1336_s10  ;;  %s1060_s22 = scalar_lea.sflag [#allocation13], %s2085_s8 }
  0x88   : > { %v562_v29 = vsub.s32 %v2143_v27, %v561_v28  ;;  %s1675_s11 = scalar_lea.vmem %s2190_s14, 16  ;;  %s1853_s15 = smov [#allocation12]  }
  0x89   : > { %1381 = vmatpush3.bf16.msra.mxu0 %v1562_v2  ;;  %1401 = vmatpush3.bf16.msra.mxu1 %v1562_v2  ;;  %p1676_p3 = scmp.ne.s32.totalorder %s2190_s14, %s1675_s11  ;;  %s1679_s0 = sshll.u32 %s1853_s15, 4  ;;  %s1680_s0 = int_to_ptr.vmem [resolvable:$false] %s1679_s0 }
  0x8a   : > { %1382 = vmatprep.subr.bf16.mxu0 %v1848_v0  ;;  %1402 = vmatprep.subr.bf16.mxu1 %v1848_v0  ;;  %vm563_vm1 = vcmp.ge.s32.totalorder %v562_v29, 0  ;;  %vm564_vm2 = vcmp.lt.s32.totalorder %v562_v29, 10  ;;  %v556_v29 = vadd.s32 3, %v2141_v16  ;;  %s1681_s17 = scalar_lea.vmem %s1680_s0, 32  ;;  %p1682_p1 = scmp.lt.s32.totalorder %s2190_s14, %s1680_s0 }
  0x8b   : > { %vm565_vm3 = vmand %vm563_vm1, %vm564_vm2  ;;  %p1677_p7 = pnand %p1676_p3, %p1993_p12  ;;  %p1683_p5 = scmp.lt.s32.totalorder %s1681_s17, %s1675_s11 }
  0x8c   : > { %v566_v38 = vsel %vm565_vm3, 0.1, %v1848_v0  ;;  %vm557_vm13 = vcmp.lt.s32.totalorder %v2143_v27, %v556_v29 }
  0x8d   : > { %1383 = vmatpush3.bf16.msra.mxu0 %v1563_v3  ;;  %1403 = vmatpush3.bf16.msra.mxu1 %v1563_v3  ;;  %vm558_vm1 = vmand %vm555_vm12, %vm557_vm13  ;;  %p1678_p9 = pneg %p1677_p7  ;;  %p1684_p2 = por %p1683_p5, %p1682_p1 }
  0x8e   : > { %1384 = vmatprep.subr.bf16.mxu0 %v1848_v0  ;;  %1404 = vmatprep.subr.bf16.mxu1 %v1848_v0 }
  0x8f   : > { %p1685_p6 = pnand %p1684_p2, %p1678_p9 }
  0x91   : > { %1385 = vmatpush3.bf16.msra.mxu0 %v1564_v4  ;;  %1405 = vmatpush3.bf16.msra.mxu1 %v1564_v4 }
  0x92   : > { %1386 = vmatprep.subr.bf16.mxu0 %v1848_v0  ;;  %1406 = vmatprep.subr.bf16.mxu1 %v1848_v0 }
  0x95   : > { %1387 = vmatpush3.bf16.msra.mxu0 %v1565_v5  ;;  %1407 = vmatpush3.bf16.msra.mxu1 %v1565_v5 }
  0x96   : > { %1388 = vmatprep.subr.bf16.mxu0 %v1848_v0  ;;  %1408 = vmatprep.subr.bf16.mxu1 %v1848_v0 }
  0x99   : > { %1389 = vmatpush3.bf16.msra.mxu0 %v1566_v6  ;;  %1409 = vmatpush3.bf16.msra.mxu1 %v1566_v6 }
  0x9a   : > { %1390 = vmatprep.subr.bf16.mxu0 %v1848_v0  ;;  %1410 = vmatprep.subr.bf16.mxu1 %v1848_v0 }
  0x9d   : > { %1391 = vmatpush3.bf16.msra.mxu0 %v1567_v7  ;;  %1411 = vmatpush3.bf16.msra.mxu1 %v1567_v7 }
  0x9e   : > { %1392 = vmatprep.subr.bf16.mxu0 %v1848_v0  ;;  %1412 = vmatprep.subr.bf16.mxu1 %v1848_v0 }
  0xa1   : > { %1393 = vmatpush3.bf16.msra.mxu0 %v1568_v8  ;;  %1413 = vmatpush3.bf16.msra.mxu1 %v1568_v8 }
  0xa2   : > { %1459 = vmatprep.subr.bf16.mxu0 %v1850_v11  ;;  %1462 = vmatprep.subr.bf16.mxu1 %v1850_v11 }
  0xa4   : > { %1395 = vmatmul.mubr.bf16.vlgmr.msra.gmra.mrb[0].mxu0 %v1569_v9  ;;  %1415 = vmatmul.mubr.bf16.vlgmr.msra.gmra.mrb[0].mxu1 %v1570_v10 }
  0xa5   : > { %1422 = vmatprep.mubr.msk.f32.mxu0 %vm1849_vm0, %v1848_v0  ;;  %1429 = vmatprep.mubr.msk.f32.mxu1 %vm1849_vm0, %v1848_v0 }
 0x177   : > { %v491_v14 = vpop.f32.mrb[0].mxu0  ;;  %v542_v15 = vpop.f32.mrb[0].mxu1 }
 0x178   : > { %v492_v17 = vadd.f32 %v1314_v13, %v491_v14  ;;  %v543_v18 = vadd.f32 %v1314_v13, %v542_v15  ;;  %v1396_v19 = vpop.f32.mrb[1].mxu0  ;;  %v1416_v20 = vpop.f32.mrb[1].mxu1 }
 0x179   : > { %v494_v21 = vpop.f32.mrb[2].mxu0  ;;  %v545_v22 = vpop.f32.mrb[2].mxu1 }
 0x17a   : > { %1571 = vtanh.f32 %v492_v17  ;;  %v495_v23 = vadd.f32 %v1314_v13, %v494_v21  ;;  %v546_v24 = vadd.f32 %v1314_v13, %v545_v22  ;;  %v1397_v25 = vpop.f32.mrb[3].mxu0  ;;  %v1417_v26 = vpop.f32.mrb[3].mxu1 }
 0x17b   : > { %1573 = vtanh.f32 %v543_v18 }
 0x17c   : > { %1575 = vtanh.f32 %v495_v23 }
 0x17d   : > { %1577 = vtanh.f32 %v546_v24 }
 0x184   : > { %v2147_v30 = vpop.eup %1571 }
 0x185   : > { %v1574_v31 = vpop.eup %1573 }
 0x186   : > { %v2149_v32 = vpop.eup %1575 }
 0x187   : > { %v1578_v33 = vpop.eup %1577  ;;  %v1460_v34 = vpack.c.bf16 %v2149_v32, %v2147_v30 }
 0x188   : > { %v2153_v35 = vpack.c.bf16 %v1578_v33, %v1574_v31 }
 0x189   : > { %1461 = vmatpush3.bf16.msra.mxu0 %v1460_v34  ;;  %v715_v36 = vunpack.c.l.bf16 %v1460_v34  ;;  %v716_v37 = vunpack.c.h.bf16 %v1460_v34 }
 0x18a   : > { %1464 = vmatpush3.bf16.msra.mxu1 %v2153_v35  ;;  %v717_v39 = vunpack.c.l.bf16 %v2153_v35  ;;  %v718_v40 = vunpack.c.h.bf16 %v2153_v35 }
 0x18b   : > { %v719_v41 = vmul.f32 %v715_v36, %v715_v36  ;;  %1439 = vmatprep.subr.bf16.mxu1 %v1848_v0  ;;  %v720_v44 = vmul.f32 %v716_v37, %v716_v37 }
 0x18c   : > { %v727_v42 = vmul.f32 %v717_v39, %v717_v39  ;;  %v728_v43 = vmul.f32 %v718_v40, %v718_v40  ;;  %1423 = vmatmul.mubr.msk.f32.vlgmr.msra.gmra.mrb[4].mxu0 %vm567_vm4, %v566_v38 }
 0x18d   : > { %721 = vadd.xlane.f32.xlu0 %v719_v41  ;;  %1430 = vmatmul.mubr.msk.f32.vlgmr.msra.gmra.mrb[4].mxu1 %vm567_vm4, %v566_v38  ;;  %v724_v47 = vsel %vm723_vm5, %v720_v44, 0.0 }
 0x18e   : > { %v1465_v45 = vpack.c.bf16 %v728_v43, %v727_v42  ;;  %1436 = vmatprep.mubr.f32.mxu0 %v1851_v46  ;;  %1441 = vmatprep.mubr.msk.bf16.mxu1 %vm1849_vm0, %v1848_v0 }
 0x190   : > { %1466 = vmatprep.subr.bf16.mxu0 %v1465_v45 }
 0x191   : > { %725 = vadd.xlane.f32.xlu0 %v724_v47 }
 0x192   : > { %1468 = vmatpush3.bf16.xpose.msra.mxu0 %v1465_v45 }
 0x193   : > { %1440 = vmatpush3.bf16.xpose.msra.mxu1 %v2153_v35  ;;  %1469 = vmatprep.subr.bf16.mxu0 %v1850_v11 }
 0x199   : > { %1437 = vmatmul.mubr.f32.vlgmr.msra.gmra.mrb[6].mxu0 %v1851_v46 }
 0x19a   : > { %1442 = vmatmul.mubr.bf16.vlgmr.msra.gmra.mrb[8].mxu1 %v1460_v34  ;;  %1449 = vmatprep.mubr.msk.f32.mxu0 %vm1849_vm0, %v1848_v0 }
 0x21a   : > { %v722_v52 = vpop.xlane.xlu0 %721 }
 0x21e   : > { %v726_v59 = vpop.xlane.xlu0 %725 }
 0x25f   : > { %v637_v48 = vpop.f32.mrb[4].mxu0 }
 0x260   : > { %641 = vst [vmem:[%s370_s21] sm:$0x1] %v637_v48  ;;  %v1424_v49 = vpop.f32.mrb[5].mxu0  ;;  %v708_v50 = vpop.f32.mrb[4].mxu1 }
 0x261   : > { %712 = vst [vmem:[%s376_s18] sm:$0x1] %v708_v50  ;;  %v1431_v51 = vpop.f32.mrb[5].mxu1 }
 0x26c   : > { %v1438_v53 = vpop.f32.mrb[6].mxu0 }
 0x26d   : > { %v838_v54 = vpop.f32.mrb[8].mxu1  ;;  %v795_v55 = vpop.f32.mrb[7].mxu0  ;;  %v846_v61 = vadd.f32 %v1438_v53, %v726_v59 }
 0x26e   : > { %v847_v56 = vmul.f32 2.0, %v838_v54  ;;  %v845_v57 = vadd.f32 %v795_v55, %v722_v52  ;;  %v1443_v58 = vpop.f32.mrb[9].mxu1 }
 0x26f   : > { %v841_v60 = vpop.f32.mrb[10].mxu1 }
 0x270   : > { %v849_v62 = vsub.f32 %v845_v57, %v847_v56  ;;  %v848_v63 = vmul.f32 2.0, %v841_v60  ;;  %v1444_v1 = vpop.f32.mrb[11].mxu1 }
 0x272   : > { %v851_v2 = vmax.f32 %v849_v62, 0.0  ;;  %v850_v3 = vsub.f32 %v846_v61, %v848_v63 }
 0x274   : > { %1579 = vrsqrt.f32 %v851_v2  ;;  %v852_v4 = vmax.f32 %v850_v3, 0.0  ;;  %vm855_vm6 = vcmp.eq.f32.partialorder %v851_v2, inf  ;;  %v858_v8 = vand.u32 2147483648, %v851_v2 }
 0x275   : > { %vm857_vm7 = vcmp.eq.f32.partialorder %v851_v2, 0.0 }
 0x276   : > { %1581 = vrsqrt.f32 %v852_v4  ;;  %vm862_vm8 = vcmp.eq.f32.partialorder %v852_v4, inf  ;;  %v865_v13 = vand.u32 2147483648, %v852_v4  ;;  %vm864_vm9 = vcmp.eq.f32.partialorder %v852_v4, 0.0 }
 0x27e   : > { %v1580_v5 = vpop.eup %1579 }
 0x27f   : > { %v854_v6 = vmul.f32 %v1580_v5, %v851_v2 }
 0x280   : > { %v1582_v7 = vpop.eup %1581 }
 0x281   : > { %v856_v9 = vsel %vm855_vm6, %v851_v2, %v854_v6  ;;  %v861_v10 = vmul.f32 %v1582_v7, %v852_v4 }
 0x282   : > { %v859_v12 = vsel %vm857_vm7, %v858_v8, %v856_v9 }
 0x283   : > { %v867_v14 = vadd.f32 1.0, %v859_v12  ;;  %v863_v15 = vsel %vm862_vm8, %v852_v4, %v861_v10 }
 0x284   : > { %v866_v17 = vsel %vm864_vm9, %v865_v13, %v863_v15 }
 0x285   : > { %1583 = vrcp.f32 %v867_v14  ;;  %v868_v18 = vadd.f32 1.0, %v866_v17 }
 0x287   : > { %1585 = vrcp.f32 %v868_v18 }
 0x28f   : > { %v1584_v19 = vpop.eup %1583 }
 0x290   : > { %v874_v20 = vsel %vm873_vm10, %v1584_v19, 0.0 }
 0x291   : > { %v1586_v21 = vpop.eup %1585  ;;  %875 = vadd.xlane.f32.xlu1 %v874_v20 }
 0x292   : > { %v878_v22 = vsel %vm877_vm11, %v1586_v21, 0.0 }
 0x293   : > { %v881_v23 = vadd.f32 %v878_v22, %v874_v20 }
 0x295   : > { %879 = vadd.xlane.f32.xlu1 %v878_v22  ;;  %v882_v24 = vrot.slane %v881_v23, 4 }
 0x297   : > { %v883_v25 = vadd.f32 %v882_v24, %v881_v23 }
 0x299   : > { %v884_v26 = vrot.slane %v883_v25, 2 }
 0x29b   : > { %v885_v31 = vadd.f32 %v884_v26, %v883_v25 }
 0x29d   : > { %v886_v37 = vrot.slane %v885_v31, 1 }
 0x31e   : > { %v876_v28 = vpop.xlane.xlu1 %875 }
 0x31f   : > { %v888_v34 = vmul.f32 %v2147_v30, %v876_v28  ;;  %v887_v30 = vadd.f32 %v886_v37, %v885_v31 }
 0x322   : > { %v880_v33 = vpop.xlane.xlu1 %879 }
 0x323   : > { %v889_v36 = vmul.f32 %v2149_v32, %v880_v33  ;;  %v1325_v32 = vsel %vm558_vm1, 1.0, %v1848_v0 }
 0x324   : > { %v967_v16 = vmul.f32 %v1325_v32, %v887_v30 }
 0x325   : > { %v1470_v38 = vpack.c.bf16 %v889_v36, %v888_v34 }
 0x327   : > { %1472 = vmatpush3.bf16.msk.msra.mxu0 %vm1471_vm15, %v1470_v38 }
 0x328   : > { %1473 = vmatprep.subr.bf16.mxu0 %v1850_v11 }
 0x32a   : > { %1450 = vmatmul.mubr.msk.f32.vlgmr.msra.gmra.mrb[8].mxu0 %vm873_vm10, %v1325_v32 }
 0x32b   : > { %1476 = vmatpush3.bf16.msk.msra.mxu0 %vm1471_vm15, %v2153_v35  ;;  %1456 = vmatprep.mubr.msk.f32.mxu0 %vm1849_vm0, %v1848_v0 }
 0x32e   : > { %1457 = vmatmul.mubr.msk.f32.vlgmr.msra.gmra.mrb[10].mxu0 %vm873_vm10, %v967_v16 }
 0x32f   : > { %1688 = shalt.err (!%p1685_p6)
}
 0x330   : > { %s1689_s19 = scalar_lea.hbm %s1109_s26, 16  ;;  %s1693_s30 = scalar_lea.hbm %s2354_s7, 32 }
 0x331   : > { %p1690_p8 = scmp.ne.s32.totalorder %s1109_s26, %s1689_s19  ;;  %p1694_p4 = scmp.lt.u32.totalorder %s1109_s26, %s2354_s7 }
 0x332   : > { %p1695_p11 = scmp.lt.u32.totalorder %s1693_s30, %s1689_s19  ;;  %p1697_p3 = scmp.lt.u32.totalorder %s1689_s19, %s1109_s26 }
 0x333   : > { %p1691_p10 = pnand %p1690_p8, %p1993_p12 }
 0x334   : > { %p1696_p13 = por %p1695_p11, %p1694_p4 }
 0x335   : > { %p1692_p0 = pneg %p1691_p10 }
 0x336   : > { %p1698_p7 = por %p1697_p3, %p1696_p13 }
 0x338   : > { %p1699_p9 = pnand %p1698_p7, %p1692_p0 }
 0x33a   : > { %1702 = shalt.err (!%p1699_p9)
}
 0x33b   : > { %1488 = dma.vmem_to_hbm [thread:$0]  (%p1993_p12), %s2190_s14, 16, %s1109_s26, %s1060_s22  }
 0x33c   : > { %s357_s2 = scalar_lea.vmem [#allocation8], %s2088_s23  ;;  %s1334_s11 = sshll.u32 %s1918_s28, 7 }
 0x33d   : > { %s1072_s12 = sshll.u32 %s357_s2, 4  ;;  %s2224_s17 = scalar_lea.hbm %s2351_s4, %s1334_s11  ;;  %s2217_s12 = int_to_ptr.vmem [resolvable:$true] %s1072_s12 }
 0x33e   : > { %s364_s19 = scalar_lea.vmem [#allocation9], %s2088_s23  ;;  %s2233_s14 = sshll.u32 %s370_s21, 4  ;;  %s2268_s14 = int_to_ptr.vmem [resolvable:$true] %s2233_s14 }
 0x33f   : > { %s2229_s29 = sshll.u32 %s364_s19, 4  ;;  %s1046_s26 = scalar_lea.sflag [#allocation4], %s2085_s8  ;;  %s2258_s29 = int_to_ptr.vmem [resolvable:$true] %s2229_s29 }
 0x340   : > { %s1703_s22 = scalar_lea.vmem %s2217_s12, 128  ;;  %s1854_s13 = smov [#allocation8]  }
 0x341   : > { %p1704_p1 = scmp.ne.s32.totalorder %s2217_s12, %s1703_s22  ;;  %s1707_s30 = sshll.u32 %s1854_s13, 4  ;;  %s1708_s30 = int_to_ptr.vmem [resolvable:$false] %s1707_s30 }
 0x342   : > { %s1709_s16 = scalar_lea.vmem %s1708_s30, 256  ;;  %p1710_p6 = scmp.lt.s32.totalorder %s2217_s12, %s1708_s30 }
 0x343   : > { %p1705_p5 = pnand %p1704_p1, %p1993_p12  ;;  %p1711_p8 = scmp.lt.s32.totalorder %s1709_s16, %s1703_s22 }
 0x345   : > { %p1706_p2 = pneg %p1705_p5  ;;  %p1712_p10 = por %p1711_p8, %p1710_p6 }
 0x347   : > { %p1713_p0 = pnand %p1712_p10, %p1706_p2 }
 0x3fd   : > { %v962_v0 = vpop.f32.mrb[8].mxu0 }
 0x3fe   : > { %966 = vst [vmem:[%s357_s2] sm:$0xff] %v962_v0  ;;  %v1451_v11 = vpop.f32.mrb[9].mxu0 }
 0x3ff   : > { %1716 = shalt.err (!%p1713_p0)
}
 0x400   : > { %s1717_s8 = scalar_lea.hbm %s2224_s17, 128  ;;  %s1721_s2 = scalar_lea.hbm %s2351_s4, 256 }
 0x401   : > { %p1718_p4 = scmp.ne.s32.totalorder %s2224_s17, %s1717_s8  ;;  %p1722_p3 = scmp.lt.u32.totalorder %s2224_s17, %s2351_s4 }
 0x402   : > { %p1723_p7 = scmp.lt.u32.totalorder %s1721_s2, %s1717_s8  ;;  %p1725_p1 = scmp.lt.u32.totalorder %s1717_s8, %s2224_s17 }
 0x403   : > { %p1719_p11 = pnand %p1718_p4, %p1993_p12 }
 0x404   : > { %p1724_p9 = por %p1723_p7, %p1722_p3 }
 0x405   : > { %p1720_p13 = pneg %p1719_p11 }
 0x406   : > { %p1726_p5 = por %p1725_p1, %p1724_p9 }
 0x408   : > { %p1727_p2 = pnand %p1726_p5, %p1720_p13 }
 0x40a   : > { %1730 = shalt.err (!%p1727_p2)
}
 0x40b   : > { %1485 = dma.vmem_to_hbm [thread:$0]  (%p1993_p12), %s2217_s12, 128, %s2224_s17, %s1046_s26   ;;  %v1040_v27 = vpop.f32.mrb[10].mxu0 }
 0x40c   : > { %s2265_s30 = scalar_lea.hbm %s2352_s5, %s1334_s11  ;;  %s2275_s21 = scalar_lea.hbm %s2353_s6, %s1336_s10  ;;  %1044 = vst [vmem:[%s364_s19] sm:$0xff] %v1040_v27  ;;  %v1458_v35 = vpop.f32.mrb[11].mxu0 }
 0x40d   : > { %s2281_s12 = scalar_lea.sflag [#allocation10], %s320_s9  ;;  %s1731_s17 = scalar_lea.vmem %s2258_s29, 128 }
 0x40e   : > { %p1732_p6 = scmp.ne.s32.totalorder %s2258_s29, %s1731_s17  ;;  %s1855_s11 = smov [#allocation9]  }
 0x40f   : > { %s1735_s26 = sshll.u32 %s1855_s11, 4  ;;  %s1736_s26 = int_to_ptr.vmem [resolvable:$false] %s1735_s26 }
 0x410   : > { %p1733_p8 = pnand %p1732_p6, %p1993_p12  ;;  %s1737_s18 = scalar_lea.vmem %s1736_s26, 256 }
 0x411   : > { %p1738_p0 = scmp.lt.s32.totalorder %s2258_s29, %s1736_s26  ;;  %p1739_p4 = scmp.lt.s32.totalorder %s1737_s18, %s1731_s17 }
 0x412   : > { %p1734_p10 = pneg %p1733_p8 }
 0x413   : > { %p1740_p11 = por %p1739_p4, %p1738_p0 }
 0x415   : > { %p1741_p13 = pnand %p1740_p11, %p1734_p10 }
 0x417   : > { %1744 = shalt.err (!%p1741_p13)
}
 0x418   : > { %s1745_s28 = scalar_lea.hbm %s2265_s30, 128  ;;  %s1749_s10 = scalar_lea.hbm %s2352_s5, 256 }
 0x419   : > { %p1746_p3 = scmp.ne.s32.totalorder %s2265_s30, %s1745_s28  ;;  %p1750_p1 = scmp.lt.u32.totalorder %s2265_s30, %s2352_s5 }
 0x41a   : > { %p1751_p5 = scmp.lt.u32.totalorder %s1749_s10, %s1745_s28  ;;  %p1753_p6 = scmp.lt.u32.totalorder %s1745_s28, %s2265_s30 }
 0x41b   : > { %p1747_p7 = pnand %p1746_p3, %p1993_p12 }
 0x41c   : > { %p1752_p2 = por %p1751_p5, %p1750_p1 }
 0x41d   : > { %p1748_p9 = pneg %p1747_p7 }
 0x41e   : > { %p1754_p8 = por %p1753_p6, %p1752_p2 }
 0x420   : > { %p1755_p10 = pnand %p1754_p8, %p1748_p9 }
 0x422   : > { %1758 = shalt.err (!%p1755_p10)
}
 0x423   : > { %1486 = dma.vmem_to_hbm [thread:$0]  (%p1993_p12), %s2258_s29, 128, %s2265_s30, %s2281_s12  }
 0x424   : > { %s1759_s15 = scalar_lea.vmem %s2268_s14, 16  ;;  %s1856_s0 = smov [#allocation11]  }
 0x425   : > { %p1760_p0 = scmp.ne.s32.totalorder %s2268_s14, %s1759_s15  ;;  %s1763_s22 = sshll.u32 %s1856_s0, 4  ;;  %s1764_s22 = int_to_ptr.vmem [resolvable:$false] %s1763_s22 }
 0x426   : > { %s1765_s13 = scalar_lea.vmem %s1764_s22, 32  ;;  %p1766_p13 = scmp.lt.s32.totalorder %s2268_s14, %s1764_s22 }
 0x427   : > { %p1761_p4 = pnand %p1760_p0, %p1993_p12  ;;  %p1767_p3 = scmp.lt.s32.totalorder %s1765_s13, %s1759_s15 }
 0x429   : > { %p1762_p11 = pneg %p1761_p4  ;;  %p1768_p7 = por %p1767_p3, %p1766_p13 }
 0x42b   : > { %p1769_p9 = pnand %p1768_p7, %p1762_p11 }
 0x42d   : > { %1772 = shalt.err (!%p1769_p9)
}
 0x42e   : > { %s1773_s29 = scalar_lea.hbm %s2275_s21, 16  ;;  %s1777_s8 = scalar_lea.hbm %s2353_s6, 32 }
 0x42f   : > { %p1774_p1 = scmp.ne.s32.totalorder %s2275_s21, %s1773_s29  ;;  %p1778_p6 = scmp.lt.u32.totalorder %s2275_s21, %s2353_s6 }
 0x430   : > { %p1779_p8 = scmp.lt.u32.totalorder %s1777_s8, %s1773_s29  ;;  %p1781_p0 = scmp.lt.u32.totalorder %s1773_s29, %s2275_s21 }
 0x431   : > { %p1775_p5 = pnand %p1774_p1, %p1993_p12 }
 0x432   : > { %p1780_p10 = por %p1779_p8, %p1778_p6 }
 0x433   : > { %p1776_p2 = pneg %p1775_p5 }
 0x434   : > { %p1782_p4 = por %p1781_p0, %p1780_p10 }
 0x436   : > { %p1783_p11 = pnand %p1782_p4, %p1776_p2 }
 0x438   : > { %1786 = shalt.err (!%p1783_p11)
}
 0x439   : > { %1487 = dma.vmem_to_hbm [thread:$0]  (%p1993_p12), %s2268_s14, 16, %s2275_s21, %s2281_s12  }
 0x43a PF: > { %s2388_s26 = sld [smem:[#allocation21_spill]]  ;;  %s1123_s18 = sand.u32 1, %s1829_s24  }
 0x43b   : > { %p2390_p3 = scmp.ge.s32.totalorder %s1841_s27, 2  ;;  %s1124_s28 = scalar_lea.sflag [#allocation4], %s1123_s18 }
 0x440   : > { %p2389_p13 = scmp.ne.s32.totalorder %s2388_s26, 0 }
 0x442   : > { %p1505_p7 = pnand %p2390_p3, %p2389_p13 }
 0x444   : > { %1816 = dma.done.wait (!%p1505_p7), %s1124_s28, 128  }
 0x445   : > { %1818 = vsyncadd (!%p1505_p7), %s1124_s28, 4294967168  ;;  %s2391_s23 = sadd.s32 4294967294, %s1841_s27  }
 0x446   : > { %s1132_s9 = sand.u32 1, %s2391_s23  }
 0x447   : > { %s1133_s10 = scalar_lea.sflag [#allocation10], %s1132_s9 }
 0x448   : > { %1820 = dma.done.wait (!%p1505_p7), %s1133_s10, 144  }
 0x449   : > { %1822 = vsyncadd (!%p1505_p7), %s1133_s10, 4294967152  ;;  %s1150_s20 = scalar_lea.sflag [#allocation13], %s1123_s18 }
 0x44a   : > { %1824 = dma.done.wait (!%p1505_p7), %s1150_s20, 16  }
 0x44b   : > { %1826 = vsyncadd (!%p1505_p7), %s1150_s20, 4294967280  ;;  %s2392_s27 = sld [smem:[#allocation22_spill]]  ;;  %s2393_s14 = sld [smem:[#allocation20_spill]] }
 0x44c   : > { %s2394_s26 = sld [smem:[#allocation23_spill]]  ;;  %s2395_s24 = smov %s1833_s25 }
 0x451   : > { %p30_p12 = scmp.ge.s32.totalorder %s2392_s27, 4   ;;  %s2396_s25 = smov %s2393_s14 }
 0x453   :  { %32 = sbr.rel (!%p30_p12) target bundleno = 14 (0xe), region = 147 }
 0x45a   :  { %1154 = vsyncpa [#allocation3], 1 }
 0x45b   :  { %1156 = vsyncpa [#allocation3 + $0x1], 1 }
 0x45c   :  { %1157 = vsyncpa [#allocation6], 1 }
 0x45d   :  { %1159 = vsyncpa [#allocation6 + $0x1], 1 }
 0x45e   :  { %1160 = vsyncpa [#allocation4], 1 }
 0x45f   :  { %1162 = vsyncpa [#allocation4 + $0x1], 1 }
 0x460   :  { %1163 = vsyncpa [#allocation10], 1 }
 0x461   :  { %1165 = vsyncpa [#allocation10 + $0x1], 1 }
 0x462   :  { %1166 = vsyncpa [#allocation13], 1 }
 0x463   :  { %1168 = vsyncpa [#allocation13 + $0x1], 1 }

</bundles_post_ra>
